<compile_context>
chip_gen: v6e
topology: v6e:2x2x1
jax: 0.10.0
libtpu: 0.0.40
codegen_flags: <defaults>
</compile_context>

<pallas_src>
import math

import jax
import jax.numpy as jnp
from jax.experimental import pallas as pl
from jax.experimental.pallas import tpu as pltpu


def _round_up(a, b):
    return (a + b - 1) // b * b


def _pad2d(a, rows, cols):
    out = jnp.zeros((rows, cols), a.dtype)
    return out.at[: a.shape[0], : a.shape[1]].set(a)


def _dense_adjacency(n, edge_index):
    # PyG GINConv (eps=0): out[i] = x[i] + sum_{(j->i) in E} x[j]
    src, dst = edge_index[0], edge_index[1]
    adj = jnp.zeros((n, n), jnp.float32).at[dst, src].add(1.0)
    return adj + jnp.eye(n, dtype=jnp.float32)


def _make_gconv_kernel(n_true, tm, tk, p, adj_resident):
    """Fused GIN-stack kernel; tiling constants and layout flags closed over."""

    def kernel(adj_ref, x_hbm, w1_ref, b1_ref, w2_ref, b2_ref,
               gamma_ref, beta_ref, pool_ref, cnt_ref,
               z_out_hbm, g_out_ref,
               z_cur, h_scr, agg, s_sum, s_sq, g_acc, copy_sem, *opt_scratch):
        adj_vmem = opt_scratch[0] if adj_resident else None

        l = pl.program_id(0)               # layer
        i = pl.program_id(1)               # node-row tile
        k = pl.program_id(2)               # aggregation contraction tile
        mt = pl.num_programs(1)
        kt = pl.num_programs(2)

        # ---- one-time init: DMA x (and, on the resident path, the adjacency) ----
        @pl.when((l == 0) & (i == 0) & (k == 0))
        def _():
            cp_x = pltpu.make_async_copy(x_hbm, z_cur, copy_sem.at[0])
            cp_x.start()
            if adj_resident:
                cp_a = pltpu.make_async_copy(adj_ref, adj_vmem, copy_sem.at[1])
                cp_a.start()
                cp_a.wait()
            cp_x.wait()

        # ---- per-(layer, row-tile) aggregation accumulator -----------------------
        @pl.when(k == 0)
        def _():
            agg[...] = jnp.zeros_like(agg)

        # ---- per-layer BN / pooled-sum accumulators -------------------------------
        @pl.when((i == 0) & (k == 0))
        def _():
            s_sum[...] = jnp.zeros_like(s_sum)
            s_sq[...] = jnp.zeros_like(s_sq)
            g_acc[...] = jnp.zeros_like(g_acc)

        # ---- 1) GIN aggregation (A + I) @ z on the native bf16 MXU path ----------
        koff = pl.multiple_of(k * tk, 128)
        z_tile = z_cur[pl.ds(koff, tk), :].astype(jnp.bfloat16)
        if adj_resident:
            a_tile = adj_vmem[...]           # tm = tk = n_pad on the resident path
        else:
            a_tile = adj_ref[...]            # streamed bf16 (tm, tk) block
        agg[...] += jnp.dot(a_tile, z_tile, preferred_element_type=jnp.float32)

        # ---- 2) last k tile: MLP(+ReLU), masked h, BN stats, pooled-sum ----------
        @pl.when(k == kt - 1)
        def _():
            h = jnp.dot(agg[...].astype(jnp.bfloat16), w1_ref[...],
                        preferred_element_type=jnp.float32) + b1_ref[...]
            h = jnp.maximum(h, 0.0)
            h = jnp.dot(h.astype(jnp.bfloat16), w2_ref[...],
                        preferred_element_type=jnp.float32) + b2_ref[...]
            h = jnp.maximum(h, 0.0)                       # F.relu before BatchNorm
            # zero padded node rows once: stats / pooling / h_scr stay clean
            row = jax.lax.broadcasted_iota(jnp.int32, (tm, p), 0) + i * tm
            h = jnp.where(row < n_true, h, 0.0)
            ioff = pl.multiple_of(i * tm, 128)
            h_scr[pl.ds(ioff, tm), :] = h
            s_sum[...] += jnp.sum(h, axis=0, keepdims=True)
            s_sq[...] += jnp.sum(h * h, axis=0, keepdims=True)
            g_acc[...] += jnp.dot(pool_ref[...], h.astype(jnp.bfloat16),
                                  preferred_element_type=jnp.float32)

        # ---- 3) layer finalize: BatchNorm affine + pooled affine + z writeback ----
        @pl.when((i == mt - 1) & (k == kt - 1))
        def _():
            inv_n = 1.0 / n_true
            mean = s_sum[...] * inv_n
            var = jnp.maximum(s_sq[...] * inv_n - mean * mean, 0.0)   # biased var
            inv_std = jax.lax.rsqrt(var + 1e-5)
            scale = gamma_ref[...] * inv_std              # (1, p)
            shift = beta_ref[...] - mean * scale          # (1, p)
            z_cur[...] = h_scr[...] * scale + shift       # next layer's input
            # lane-dense per-layer z slab DMA'd straight to HBM (no VMEM out slab)
            cp_z = pltpu.make_async_copy(z_cur, z_out_hbm.at[l], copy_sem.at[0])
            cp_z.start()
            cp_z.wait()
            # global_add_pool(z_l) = (sum_{i in g} h_i) * scale + n_g * shift
            g_out_ref[...] = g_acc[...] * scale + cnt_ref[...] * shift

    return kernel


def _resident_vmem_bytes(n_pad, p, g_pad):
    """Conservative VMEM estimate for the adjacency-resident configuration."""
    return (n_pad * n_pad * 2                     # adjacency, resident (single copy)
            + 3 * n_pad * p * 4                   # z_cur + h_scr + agg (tm = n_pad)
            + 2 * g_pad * n_pad * 2               # pool blocks (bf16, double-buffered)
            + 3 * g_pad * p * 4                   # g_acc + double-buffered g out block
            + 2 * (2 * p * p * 2 + 4 * p * 4)     # per-layer params (double-buffered)
            + 4 * p * 4 + 2 * g_pad * 4)          # BN stat scratch + node counts


def gconv_forward(params, x, edge_index, batch, num_graphs, *, tiles=None):
    """Fused forward of the GIN stack.  Returns (z_cat [N, L*H], g_cat [G, L*H])."""
    n, d = x.shape
    num_layers = len(params)
    hidden = params[0]["w2"].shape[1]

    p = _round_up(max(d, hidden, 1), 128)         # shared lane-padded feature width
    g_pad = _round_up(max(num_graphs, 1), 8)

    # generation-aware VMEM budget (v5e/v6e: 128 MiB, v7x: 64 MiB per TensorCore)
    try:
        vmem_cap = int(pltpu.get_tpu_info().vmem_capacity_bytes)
    except Exception:
        vmem_cap = 64 * 1024 * 1024
    vmem_limit = int(0.9 * vmem_cap)

    if tiles is not None:                         # explicit override (used for tests)
        tm, tk = tiles
        adj_resident = False
        n_pad = _round_up(n, math.lcm(tm, tk))
    else:
        n_pad_r = _round_up(n, 128)
        if _resident_vmem_bytes(n_pad_r, p, g_pad) <= int(0.8 * vmem_cap):
            # adjacency fits VMEM: keep it resident across all L layers, one grid
            # step per layer (removes (L-1)/L of the adjacency HBM traffic).
            adj_resident = True
            n_pad = n_pad_r
            tm = tk = n_pad
        else:
            # streaming path: big tiles so grid steps are not overhead-bound.
            adj_resident = False
            tm, tk = 512, 1024
            n_pad = _round_up(n, math.lcm(tm, tk))

    # ---- densified graph structure (JAX glue, outside the kernel) ----------------
    adj_hat = _pad2d(_dense_adjacency(n, edge_index), n_pad, n_pad).astype(jnp.bfloat16)
    onehot = (batch[None, :] == jnp.arange(num_graphs, dtype=batch.dtype)[:, None])
    onehot = onehot.astype(jnp.float32)
    pool = _pad2d(onehot, g_pad, n_pad).astype(jnp.bfloat16)        # 0/1 exact in bf16
    counts = _pad2d(jnp.sum(onehot, axis=1, keepdims=True), g_pad, 1)
    x_pad = _pad2d(x.astype(jnp.float32), n_pad, p)

    # ---- stacked, zero-padded per-layer parameters (weights bf16 for the MXU) -----
    w1 = jnp.stack([_pad2d(lp["w1"], p, p) for lp in params]).astype(jnp.bfloat16)
    w2 = jnp.stack([_pad2d(lp["w2"], p, p) for lp in params]).astype(jnp.bfloat16)
    b1 = jnp.stack([_pad2d(lp["b1"], 1, p) for lp in params])
    b2 = jnp.stack([_pad2d(lp["b2"], 1, p) for lp in params])
    gamma = jnp.stack([_pad2d(lp["gamma"], 1, p) for lp in params])
    beta = jnp.stack([_pad2d(lp["beta"], 1, p) for lp in params])

    mt, kt = n_pad // tm, n_pad // tk
    grid = (num_layers, mt, kt)

    adj_spec = (pl.BlockSpec(memory_space=pl.ANY) if adj_resident
                else pl.BlockSpec((tm, tk), lambda l, i, k: (i, k)))
    in_specs = [
        adj_spec,                                                        # adjacency
        pl.BlockSpec(memory_space=pl.ANY),                               # x (copied once)
        pl.BlockSpec((pl.Squeezed(), p, p), lambda l, i, k: (l, 0, 0)),  # w1
        pl.BlockSpec((pl.Squeezed(), 1, p), lambda l, i, k: (l, 0, 0)),  # b1
        pl.BlockSpec((pl.Squeezed(), p, p), lambda l, i, k: (l, 0, 0)),  # w2
        pl.BlockSpec((pl.Squeezed(), 1, p), lambda l, i, k: (l, 0, 0)),  # b2
        pl.BlockSpec((pl.Squeezed(), 1, p), lambda l, i, k: (l, 0, 0)),  # gamma
        pl.BlockSpec((pl.Squeezed(), 1, p), lambda l, i, k: (l, 0, 0)),  # beta
        pl.BlockSpec((g_pad, tm), lambda l, i, k: (0, i)),               # pool tiles
        pl.BlockSpec((g_pad, 1), lambda l, i, k: (0, 0)),                # node counts
    ]
    out_specs = (
        pl.BlockSpec(memory_space=pl.ANY),                               # z (L,n_pad,p)
        pl.BlockSpec((g_pad, p), lambda l, i, k: (0, l)),                # g slab block l
    )
    scratch = [
        pltpu.VMEM((n_pad, p), jnp.float32),    # z_cur (layer input, resident)
        pltpu.VMEM((n_pad, p), jnp.float32),    # h_scr (pre-BN activations)
        pltpu.VMEM((tm, p), jnp.float32),       # agg   (A @ z accumulator)
        pltpu.VMEM((1, p), jnp.float32),        # s_sum (BN sum)
        pltpu.VMEM((1, p), jnp.float32),        # s_sq  (BN sum of squares)
        pltpu.VMEM((g_pad, p), jnp.float32),    # g_acc (pooled pre-BN sums)
        pltpu.SemaphoreType.DMA((2,)),          # manual-copy semaphores
    ]
    if adj_resident:
        scratch.append(pltpu.VMEM((n_pad, n_pad), jnp.bfloat16))  # resident adjacency

    kernel = _make_gconv_kernel(n_true=n, tm=tm, tk=tk, p=p, adj_resident=adj_resident)

    z_slab, g_slab = pl.pallas_call(
        kernel,
        out_shape=(
            jax.ShapeDtypeStruct((num_layers, n_pad, p), jnp.float32),
            jax.ShapeDtypeStruct((g_pad, num_layers * p), jnp.float32),
        ),
        grid_spec=pltpu.PrefetchScalarGridSpec(
            num_scalar_prefetch=0,
            grid=grid,
            in_specs=in_specs,
            out_specs=out_specs,
            scratch_shapes=scratch,
        ),
        compiler_params=pltpu.CompilerParams(
            dimension_semantics=("arbitrary", "arbitrary", "arbitrary"),
            vmem_limit_bytes=vmem_limit,
        ),
    )(adj_hat, x_pad, w1, b1, w2, b2, gamma, beta, pool, counts)

    # un-pad: slice real rows / features back out of the lane-dense slabs
    z_cat = jnp.transpose(z_slab[:, :n, :hidden], (1, 0, 2)).reshape(
        n, num_layers * hidden)
    g_cat = g_slab.reshape(g_pad, num_layers, p)[:num_graphs, :, :hidden].reshape(
        num_graphs, num_layers * hidden)
    return z_cat, g_cat


def gconv_reference(params, x, edge_index, batch, num_graphs):
    """Pure-JAX mirror of the kernel math (same bf16 casts) used for validation."""
    n = x.shape[0]
    adj = _dense_adjacency(n, edge_index).astype(jnp.bfloat16)
    onehot = (batch[None, :] == jnp.arange(num_graphs, dtype=batch.dtype)[:, None])
    onehot = onehot.astype(jnp.float32)
    cnt = jnp.sum(onehot, axis=1, keepdims=True)
    pool = onehot.astype(jnp.bfloat16)
    z = x.astype(jnp.float32)
    zs, gs = [], []
    for lp in params:
        aggr = jnp.dot(adj, z.astype(jnp.bfloat16), preferred_element_type=jnp.float32)
        h = jnp.dot(aggr.astype(jnp.bfloat16), lp["w1"].astype(jnp.bfloat16),
                    preferred_element_type=jnp.float32) + lp["b1"]
        h = jnp.maximum(h, 0.0)
        h = jnp.dot(h.astype(jnp.bfloat16), lp["w2"].astype(jnp.bfloat16),
                    preferred_element_type=jnp.float32) + lp["b2"]
        h = jnp.maximum(h, 0.0)
        mean = jnp.mean(h, axis=0, keepdims=True)
        var = jnp.maximum(jnp.mean(h * h, axis=0, keepdims=True) - mean * mean, 0.0)
        inv_std = jax.lax.rsqrt(var + 1e-5)
        scale = lp["gamma"] * inv_std
        shift = lp["beta"] - mean * scale
        zl = h * scale + shift
        gsum = jnp.dot(pool, h.astype(jnp.bfloat16), preferred_element_type=jnp.float32)
        zs.append(zl)
        gs.append(gsum * scale + cnt * shift)
        z = zl
    return jnp.concatenate(zs, axis=1), jnp.concatenate(gs, axis=1)


def init_gconv_params(key, input_dim, hidden_dim, num_layers):
    params = []
    for i in range(num_layers):
        in_dim = input_dim if i == 0 else hidden_dim
        key, k1, k2, k3, k4 = jax.random.split(key, 5)
        params.append({
            # weights stored as [in, out] so the kernel computes x @ W + b
            "w1": jax.random.normal(k1, (in_dim, hidden_dim), jnp.float32) * 0.1,
            "b1": jax.random.normal(k2, (1, hidden_dim), jnp.float32) * 0.1,
            "w2": jax.random.normal(k3, (hidden_dim, hidden_dim), jnp.float32) * 0.1,
            "b2": jax.random.normal(k4, (1, hidden_dim), jnp.float32) * 0.1,
            # BatchNorm1d default init: weight=1, bias=0
            "gamma": jnp.ones((1, hidden_dim), jnp.float32),
            "beta": jnp.zeros((1, hidden_dim), jnp.float32),
        })
    return params


def _allclose(a, b, tol=5e-2):
    a = jnp.asarray(a, jnp.float32)
    b = jnp.asarray(b, jnp.float32)
    err = float(jnp.max(jnp.abs(a - b)))
    ref = float(jnp.max(jnp.abs(b)))
    return err <= tol * (1.0 + ref)


if __name__ == "__main__":
    key = jax.random.PRNGKey(0)

    num_nodes, input_dim, hidden_dim = 16, 8, 32
    num_layers, num_graphs, num_edges = 3, 2, 40

    key, kx, ke = jax.random.split(key, 3)
    x = jax.random.normal(kx, (num_nodes, input_dim), jnp.float32)
    edge_index = jax.random.randint(ke, (2, num_edges), 0, num_nodes, dtype=jnp.int32)
    batch = jnp.concatenate([
        jnp.zeros((num_nodes // 2,), jnp.int32),
        jnp.ones((num_nodes - num_nodes // 2,), jnp.int32),
    ])
    params = init_gconv_params(key, input_dim, hidden_dim, num_layers)

    forward = jax.jit(gconv_forward, static_argnums=(4,), static_argnames=("tiles",))

    # 1) adjacency-resident path (default for graphs that fit VMEM)
    z, g = forward(params, x, edge_index, batch, num_graphs)
    jax.block_until_ready((z, g))
    assert z.shape == (num_nodes, hidden_dim * num_layers)
    assert g.shape == (num_graphs, hidden_dim * num_layers)
    assert bool(jnp.all(jnp.isfinite(z))) and bool(jnp.all(jnp.isfinite(g)))
    z_ref, g_ref = gconv_reference(params, x, edge_index, batch, num_graphs)
    assert _allclose(z, z_ref), "resident path: z mismatch vs reference"
    assert _allclose(g, g_ref), "resident path: g mismatch vs reference"

    # 2) streaming path (small forced tiles exercise the multi-tile grid:
    #    k-accumulation, cross-row-tile BN stats, padded-row masking, pooled sums)
    n2, g2, e2_cnt = 200, 3, 600
    key, kx2, ke2, kb2 = jax.random.split(key, 4)
    x2 = jax.random.normal(kx2, (n2, input_dim), jnp.float32)
    edge_index2 = jax.random.randint(ke2, (2, e2_cnt), 0, n2, dtype=jnp.int32)
    batch2 = jnp.sort(jax.random.randint(kb2, (n2,), 0, g2, dtype=jnp.int32))
    z2, gp2 = forward(params, x2, edge_index2, batch2, g2, tiles=(128, 128))
    jax.block_until_ready((z2, gp2))
    z2_ref, gp2_ref = gconv_reference(params, x2, edge_index2, batch2, g2)
    assert _allclose(z2, z2_ref), "streaming path: z mismatch vs reference"
    assert _allclose(gp2, gp2_ref), "streaming path: g mismatch vs reference"

    print("KERNEL_OK")
</pallas_src>

<mosaic_0001>
module attributes {stable_mosaic.version = 11 : i64} {
  func.func private @main(%arg0: i32) attributes {dimension_semantics = [#tpu.dimension_semantics<core_parallel>], iteration_bounds = array<i64: 2>, tpu.core_type = #tpu.core_type<sc_scalar_subcore>, window_params = []} {
    return
  }
}

module attributes {stable_mosaic.version = 11 : i64} {
  func.func private @main(%arg0: i32) attributes {dimension_semantics = [#tpu.dimension_semantics<core_parallel>], iteration_bounds = array<i64: 2>, tpu.core_type = #tpu.core_type<sc_scalar_subcore>, window_params = []} {
    return
  }
}

module attributes {stable_mosaic.version = 11 : i64} {
  func.func @kernel(%arg0: i32, %arg1: i32, %arg2: i32, %arg3: memref<128x128xbf16, #tpu.memory_space<any>>, %arg4: memref<128x128xf32, #tpu.memory_space<any>>, %arg5: memref<1x128x128xbf16, #tpu.memory_space<vmem>>, %arg6: memref<1x1x128xf32, #tpu.memory_space<vmem>>, %arg7: memref<1x128x128xbf16, #tpu.memory_space<vmem>>, %arg8: memref<1x1x128xf32, #tpu.memory_space<vmem>>, %arg9: memref<1x1x128xf32, #tpu.memory_space<vmem>>, %arg10: memref<1x1x128xf32, #tpu.memory_space<vmem>>, %arg11: memref<8x128xbf16, #tpu.memory_space<vmem>>, %arg12: memref<8x1xf32, #tpu.memory_space<vmem>>, %arg13: memref<3x128x128xf32, #tpu.memory_space<any>>, %arg14: memref<8x128xf32, #tpu.memory_space<vmem>>, %arg15: memref<128x128xf32, #tpu.memory_space<vmem>>, %arg16: memref<128x128xf32, #tpu.memory_space<vmem>>, %arg17: memref<128x128xf32, #tpu.memory_space<vmem>>, %arg18: memref<1x128xf32, #tpu.memory_space<vmem>>, %arg19: memref<1x128xf32, #tpu.memory_space<vmem>>, %arg20: memref<8x128xf32, #tpu.memory_space<vmem>>, %arg21: memref<2x!tpu.dma_semaphore, #tpu.memory_space<semaphore_mem>>, %arg22: memref<128x128xbf16, #tpu.memory_space<vmem>>) attributes {dimension_semantics = [#tpu.dimension_semantics<arbitrary>, #tpu.dimension_semantics<arbitrary>, #tpu.dimension_semantics<arbitrary>], iteration_bounds = array<i64: 3, 1, 1>, scalar_prefetch = 0 : i64, scratch_operands = 8 : i64, tpu.core_type = #tpu.core_type<tc>, window_params = [{}, {}, {transform_indices = @transform_2, window_bounds = array<i64: 1, 128, 128>}, {transform_indices = @transform_3, window_bounds = array<i64: 1, 1, 128>}, {transform_indices = @transform_4, window_bounds = array<i64: 1, 128, 128>}, {transform_indices = @transform_5, window_bounds = array<i64: 1, 1, 128>}, {transform_indices = @transform_6, window_bounds = array<i64: 1, 1, 128>}, {transform_indices = @transform_7, window_bounds = array<i64: 1, 1, 128>}, {transform_indices = @transform_8, window_bounds = array<i64: 8, 128>}, {pipeline_mode = #tpu.pipeline_mode<synchronous>, transform_indices = @transform_9, window_bounds = array<i64: 8, 1>}, {}, {transform_indices = @transform_11, window_bounds = array<i64: 8, 128>}]} {
    %c0_i32 = arith.constant 0 : i32
    %0 = arith.cmpi eq, %arg0, %c0_i32 : i32
    %c0_i32_0 = arith.constant 0 : i32
    %1 = arith.cmpi eq, %arg1, %c0_i32_0 : i32
    %2 = arith.andi %0, %1 : i1
    %c0_i32_1 = arith.constant 0 : i32
    %3 = arith.cmpi eq, %arg2, %c0_i32_1 : i32
    %4 = arith.andi %2, %3 : i1
    %5 = arith.extui %4 : i1 to i32
    %c0_i32_2 = arith.constant 0 : i32
    %6 = arith.cmpi ne, %5, %c0_i32_2 : i32
    scf.if %6 {
      %c0_i32_19 = arith.constant 0 : i32
      %33 = tpu.memref_slice %arg21[%c0_i32_19] : memref<2x!tpu.dma_semaphore, #tpu.memory_space<semaphore_mem>> -> memref<1x!tpu.dma_semaphore, #tpu.memory_space<semaphore_mem>>
      %34 = tpu.memref_squeeze %33 : memref<1x!tpu.dma_semaphore, #tpu.memory_space<semaphore_mem>> -> memref<!tpu.dma_semaphore, #tpu.memory_space<semaphore_mem>>
      tpu.enqueue_dma source(%arg4 : memref<128x128xf32, #tpu.memory_space<any>>) target(%arg15 : memref<128x128xf32, #tpu.memory_space<vmem>>) target_semaphore(%34 : memref<!tpu.dma_semaphore, #tpu.memory_space<semaphore_mem>>)
      %c1_i32 = arith.constant 1 : i32
      %35 = tpu.memref_slice %arg21[%c1_i32] : memref<2x!tpu.dma_semaphore, #tpu.memory_space<semaphore_mem>> -> memref<1x!tpu.dma_semaphore, #tpu.memory_space<semaphore_mem>>
      %36 = tpu.memref_squeeze %35 : memref<1x!tpu.dma_semaphore, #tpu.memory_space<semaphore_mem>> -> memref<!tpu.dma_semaphore, #tpu.memory_space<semaphore_mem>>
      tpu.enqueue_dma source(%arg3 : memref<128x128xbf16, #tpu.memory_space<any>>) target(%arg22 : memref<128x128xbf16, #tpu.memory_space<vmem>>) target_semaphore(%36 : memref<!tpu.dma_semaphore, #tpu.memory_space<semaphore_mem>>)
      %c1_i32_20 = arith.constant 1 : i32
      %37 = tpu.memref_slice %arg21[%c1_i32_20] : memref<2x!tpu.dma_semaphore, #tpu.memory_space<semaphore_mem>> -> memref<1x!tpu.dma_semaphore, #tpu.memory_space<semaphore_mem>>
      %38 = tpu.memref_squeeze %37 : memref<1x!tpu.dma_semaphore, #tpu.memory_space<semaphore_mem>> -> memref<!tpu.dma_semaphore, #tpu.memory_space<semaphore_mem>>
      tpu.wait_dma2 semaphore(%38 : memref<!tpu.dma_semaphore, #tpu.memory_space<semaphore_mem>>) src(%arg3 : memref<128x128xbf16, #tpu.memory_space<any>>) dst(%arg22 : memref<128x128xbf16, #tpu.memory_space<vmem>>)
      %c0_i32_21 = arith.constant 0 : i32
      %39 = tpu.memref_slice %arg21[%c0_i32_21] : memref<2x!tpu.dma_semaphore, #tpu.memory_space<semaphore_mem>> -> memref<1x!tpu.dma_semaphore, #tpu.memory_space<semaphore_mem>>
      %40 = tpu.memref_squeeze %39 : memref<1x!tpu.dma_semaphore, #tpu.memory_space<semaphore_mem>> -> memref<!tpu.dma_semaphore, #tpu.memory_space<semaphore_mem>>
      tpu.wait_dma2 semaphore(%40 : memref<!tpu.dma_semaphore, #tpu.memory_space<semaphore_mem>>) src(%arg4 : memref<128x128xf32, #tpu.memory_space<any>>) dst(%arg15 : memref<128x128xf32, #tpu.memory_space<vmem>>)
    } else {
    }
    %c0_i32_3 = arith.constant 0 : i32
    %7 = arith.cmpi eq, %arg2, %c0_i32_3 : i32
    %8 = arith.extui %7 : i1 to i32
    %c0_i32_4 = arith.constant 0 : i32
    %9 = arith.cmpi ne, %8, %c0_i32_4 : i32
    scf.if %9 {
      %cst_19 = arith.constant 0.000000e+00 : f32
      %33 = vector.broadcast %cst_19 : f32 to vector<128x128xf32>
      %c0_20 = arith.constant 0 : index
      %c0_21 = arith.constant 0 : index
      %34 = vector.load %arg17[%c0_20, %c0_21] : memref<128x128xf32, #tpu.memory_space<vmem>>, vector<128x128xf32>
      tpu.vector_store %arg17[%c0_20, %c0_21], %33 {strides = array<i32>} : memref<128x128xf32, #tpu.memory_space<vmem>>, vector<128x128xf32>,
    } else {
    }
    %c0_i32_5 = arith.constant 0 : i32
    %10 = arith.cmpi eq, %arg1, %c0_i32_5 : i32
    %c0_i32_6 = arith.constant 0 : i32
    %11 = arith.cmpi eq, %arg2, %c0_i32_6 : i32
    %12 = arith.andi %10, %11 : i1
    %13 = arith.extui %12 : i1 to i32
    %c0_i32_7 = arith.constant 0 : i32
    %14 = arith.cmpi ne, %13, %c0_i32_7 : i32
    scf.if %14 {
      %cst_19 = arith.constant 0.000000e+00 : f32
      %33 = vector.broadcast %cst_19 : f32 to vector<1x128xf32>
      %c0_20 = arith.constant 0 : index
      %c0_21 = arith.constant 0 : index
      %34 = vector.load %arg18[%c0_20, %c0_21] : memref<1x128xf32, #tpu.memory_space<vmem>>, vector<1x128xf32>
      tpu.vector_store %arg18[%c0_20, %c0_21], %33 {strides = array<i32>} : memref<1x128xf32, #tpu.memory_space<vmem>>, vector<1x128xf32>,
      %cst_22 = arith.constant 0.000000e+00 : f32
      %35 = vector.broadcast %cst_22 : f32 to vector<1x128xf32>
      %c0_23 = arith.constant 0 : index
      %c0_24 = arith.constant 0 : index
      %36 = vector.load %arg19[%c0_23, %c0_24] : memref<1x128xf32, #tpu.memory_space<vmem>>, vector<1x128xf32>
      tpu.vector_store %arg19[%c0_23, %c0_24], %35 {strides = array<i32>} : memref<1x128xf32, #tpu.memory_space<vmem>>, vector<1x128xf32>,
      %cst_25 = arith.constant 0.000000e+00 : f32
      %37 = vector.broadcast %cst_25 : f32 to vector<8x128xf32>
      %c0_26 = arith.constant 0 : index
      %c0_27 = arith.constant 0 : index
      %38 = vector.load %arg20[%c0_26, %c0_27] : memref<8x128xf32, #tpu.memory_space<vmem>>, vector<8x128xf32>
      tpu.vector_store %arg20[%c0_26, %c0_27], %37 {strides = array<i32>} : memref<8x128xf32, #tpu.memory_space<vmem>>, vector<8x128xf32>,
    } else {
    }
    %c128_i32 = arith.constant 128 : i32
    %15 = arith.muli %arg2, %c128_i32 : i32
    %16 = tpu.assume_multiple %15, 128 : i32
    %17 = arith.index_cast %16 : i32 to index
    %c0 = arith.constant 0 : index
    %18 = vector.load %arg15[%17, %c0] : memref<128x128xf32, #tpu.memory_space<vmem>>, vector<128x128xf32>
    %19 = arith.truncf %18 : vector<128x128xf32> to vector<128x128xbf16>
    %c0_8 = arith.constant 0 : index
    %c0_9 = arith.constant 0 : index
    %20 = vector.load %arg22[%c0_8, %c0_9] : memref<128x128xbf16, #tpu.memory_space<vmem>>, vector<128x128xbf16>
    %c0_10 = arith.constant 0 : index
    %c0_11 = arith.constant 0 : index
    %21 = vector.load %arg17[%c0_10, %c0_11] : memref<128x128xf32, #tpu.memory_space<vmem>>, vector<128x128xf32>
    %cst = arith.constant dense<0.000000e+00> : vector<128x128xf32>
    %22 = tpu.matmul %20, %19, %cst {dimension_numbers = #tpu.dot_dimension_numbers<[1], [0], [0], [1], [0, 0, 1, 1], [], []>} : vector<128x128xbf16>, vector<128x128xbf16>, vector<128x128xf32> -> vector<128x128xf32>
    %23 = arith.addf %21, %22 : vector<128x128xf32>
    %c0_12 = arith.constant 0 : index
    %c0_13 = arith.constant 0 : index
    %24 = vector.load %arg17[%c0_12, %c0_13] : memref<128x128xf32, #tpu.memory_space<vmem>>, vector<128x128xf32>
    tpu.vector_store %arg17[%c0_12, %c0_13], %23 {strides = array<i32>} : memref<128x128xf32, #tpu.memory_space<vmem>>, vector<128x128xf32>,
    %c0_i32_14 = arith.constant 0 : i32
    %25 = arith.cmpi eq, %arg2, %c0_i32_14 : i32
    %26 = arith.extui %25 : i1 to i32
    %c0_i32_15 = arith.constant 0 : i32
    %27 = arith.cmpi ne, %26, %c0_i32_15 : i32
    scf.if %27 {
      %c0_19 = arith.constant 0 : index
      %c0_20 = arith.constant 0 : index
      %33 = vector.load %arg17[%c0_19, %c0_20] : memref<128x128xf32, #tpu.memory_space<vmem>>, vector<128x128xf32>
      %34 = arith.truncf %33 : vector<128x128xf32> to vector<128x128xbf16>
      %c0_21 = arith.constant 0 : index
      %c0_22 = arith.constant 0 : index
      %c0_23 = arith.constant 0 : index
      %35 = vector.load %arg5[%c0_21, %c0_22, %c0_23] : memref<1x128x128xbf16, #tpu.memory_space<vmem>>, vector<1x128x128xbf16>
      %36 = vector.shape_cast %35 : vector<1x128x128xbf16> to vector<128x128xbf16>
      %cst_24 = arith.constant dense<0.000000e+00> : vector<128x128xf32>
      %37 = tpu.matmul %34, %36, %cst_24 {dimension_numbers = #tpu.dot_dimension_numbers<[1], [0], [0], [1], [0, 0, 1, 1], [], []>} : vector<128x128xbf16>, vector<128x128xbf16>, vector<128x128xf32> -> vector<128x128xf32>
      %c0_25 = arith.constant 0 : index
      %c0_26 = arith.constant 0 : index
      %c0_27 = arith.constant 0 : index
      %38 = vector.load %arg6[%c0_25, %c0_26, %c0_27] : memref<1x1x128xf32, #tpu.memory_space<vmem>>, vector<1x1x128xf32>
      %39 = vector.shape_cast %38 : vector<1x1x128xf32> to vector<1x128xf32>
      %40 = vector.broadcast %39 : vector<1x128xf32> to vector<128x128xf32>
      %41 = arith.addf %37, %40 : vector<128x128xf32>
      %cst_28 = arith.constant 0.000000e+00 : f32
      %42 = vector.broadcast %cst_28 : f32 to vector<128x128xf32>
      %43 = arith.maximumf %41, %42 : vector<128x128xf32>
      %44 = arith.truncf %43 : vector<128x128xf32> to vector<128x128xbf16>
      %c0_29 = arith.constant 0 : index
      %c0_30 = arith.constant 0 : index
      %c0_31 = arith.constant 0 : index
      %45 = vector.load %arg7[%c0_29, %c0_30, %c0_31] : memref<1x128x128xbf16, #tpu.memory_space<vmem>>, vector<1x128x128xbf16>
      %46 = vector.shape_cast %45 : vector<1x128x128xbf16> to vector<128x128xbf16>
      %cst_32 = arith.constant dense<0.000000e+00> : vector<128x128xf32>
      %47 = tpu.matmul %44, %46, %cst_32 {dimension_numbers = #tpu.dot_dimension_numbers<[1], [0], [0], [1], [0, 0, 1, 1], [], []>} : vector<128x128xbf16>, vector<128x128xbf16>, vector<128x128xf32> -> vector<128x128xf32>
      %c0_33 = arith.constant 0 : index
      %c0_34 = arith.constant 0 : index
      %c0_35 = arith.constant 0 : index
      %48 = vector.load %arg8[%c0_33, %c0_34, %c0_35] : memref<1x1x128xf32, #tpu.memory_space<vmem>>, vector<1x1x128xf32>
      %49 = vector.shape_cast %48 : vector<1x1x128xf32> to vector<1x128xf32>
      %50 = vector.broadcast %49 : vector<1x128xf32> to vector<128x128xf32>
      %51 = arith.addf %47, %50 : vector<128x128xf32>
      %cst_36 = arith.constant 0.000000e+00 : f32
      %52 = vector.broadcast %cst_36 : f32 to vector<128x128xf32>
      %53 = arith.maximumf %51, %52 : vector<128x128xf32>
      %54 = tpu.iota {dimensions = array<i32: 0>} : vector<128x128xi32>
      %c128_i32_37 = arith.constant 128 : i32
      %55 = arith.muli %arg1, %c128_i32_37 : i32
      %56 = vector.broadcast %55 : i32 to vector<128x128xi32>
      %57 = arith.addi %54, %56 : vector<128x128xi32>
      %c16_i32 = arith.constant 16 : i32
      %58 = vector.broadcast %c16_i32 : i32 to vector<128x128xi32>
      %59 = arith.cmpi slt, %57, %58 : vector<128x128xi32>
      %cst_38 = arith.constant 0.000000e+00 : f32
      %60 = vector.broadcast %cst_38 : f32 to vector<128x128xf32>
      %61 = arith.select %59, %53, %60 : vector<128x128xi1>, vector<128x128xf32>
      %c128_i32_39 = arith.constant 128 : i32
      %62 = arith.muli %arg1, %c128_i32_39 : i32
      %63 = tpu.assume_multiple %62, 128 : i32
      %64 = arith.index_cast %63 : i32 to index
      %c0_40 = arith.constant 0 : index
      %65 = vector.load %arg16[%64, %c0_40] : memref<128x128xf32, #tpu.memory_space<vmem>>, vector<128x128xf32>
      tpu.vector_store %arg16[%64, %c0_40], %61 {strides = array<i32>} : memref<128x128xf32, #tpu.memory_space<vmem>>, vector<128x128xf32>,
      %c0_41 = arith.constant 0 : index
      %c0_42 = arith.constant 0 : index
      %66 = vector.load %arg18[%c0_41, %c0_42] : memref<1x128xf32, #tpu.memory_space<vmem>>, vector<1x128xf32>
      %cst_43 = arith.constant dense<0.000000e+00> : vector<128xf32>
      %67 = vector.multi_reduction <add>, %61, %cst_43 [0] : vector<128x128xf32> to vector<128xf32>
      %68 = vector.shape_cast %67 : vector<128xf32> to vector<1x128xf32>
      %69 = arith.addf %66, %68 : vector<1x128xf32>
      %c0_44 = arith.constant 0 : index
      %c0_45 = arith.constant 0 : index
      %70 = vector.load %arg18[%c0_44, %c0_45] : memref<1x128xf32, #tpu.memory_space<vmem>>, vector<1x128xf32>
      tpu.vector_store %arg18[%c0_44, %c0_45], %69 {strides = array<i32>} : memref<1x128xf32, #tpu.memory_space<vmem>>, vector<1x128xf32>,
      %c0_46 = arith.constant 0 : index
      %c0_47 = arith.constant 0 : index
      %71 = vector.load %arg19[%c0_46, %c0_47] : memref<1x128xf32, #tpu.memory_space<vmem>>, vector<1x128xf32>
      %72 = arith.mulf %61, %61 : vector<128x128xf32>
      %cst_48 = arith.constant dense<0.000000e+00> : vector<128xf32>
      %73 = vector.multi_reduction <add>, %72, %cst_48 [0] : vector<128x128xf32> to vector<128xf32>
      %74 = vector.shape_cast %73 : vector<128xf32> to vector<1x128xf32>
      %75 = arith.addf %71, %74 : vector<1x128xf32>
      %c0_49 = arith.constant 0 : index
      %c0_50 = arith.constant 0 : index
      %76 = vector.load %arg19[%c0_49, %c0_50] : memref<1x128xf32, #tpu.memory_space<vmem>>, vector<1x128xf32>
      tpu.vector_store %arg19[%c0_49, %c0_50], %75 {strides = array<i32>} : memref<1x128xf32, #tpu.memory_space<vmem>>, vector<1x128xf32>,
      %c0_51 = arith.constant 0 : index
      %c0_52 = arith.constant 0 : index
      %77 = vector.load %arg20[%c0_51, %c0_52] : memref<8x128xf32, #tpu.memory_space<vmem>>, vector<8x128xf32>
      %c0_53 = arith.constant 0 : index
      %c0_54 = arith.constant 0 : index
      %78 = vector.load %arg11[%c0_53, %c0_54] : memref<8x128xbf16, #tpu.memory_space<vmem>>, vector<8x128xbf16>
      %79 = arith.truncf %61 : vector<128x128xf32> to vector<128x128xbf16>
      %cst_55 = arith.constant dense<0.000000e+00> : vector<8x128xf32>
      %80 = tpu.matmul %78, %79, %cst_55 {dimension_numbers = #tpu.dot_dimension_numbers<[1], [0], [0], [1], [0, 0, 1, 1], [], []>} : vector<8x128xbf16>, vector<128x128xbf16>, vector<8x128xf32> -> vector<8x128xf32>
      %81 = arith.addf %77, %80 : vector<8x128xf32>
      %c0_56 = arith.constant 0 : index
      %c0_57 = arith.constant 0 : index
      %82 = vector.load %arg20[%c0_56, %c0_57] : memref<8x128xf32, #tpu.memory_space<vmem>>, vector<8x128xf32>
      tpu.vector_store %arg20[%c0_56, %c0_57], %81 {strides = array<i32>} : memref<8x128xf32, #tpu.memory_space<vmem>>, vector<8x128xf32>,
    } else {
    }
    %c0_i32_16 = arith.constant 0 : i32
    %28 = arith.cmpi eq, %arg1, %c0_i32_16 : i32
    %c0_i32_17 = arith.constant 0 : i32
    %29 = arith.cmpi eq, %arg2, %c0_i32_17 : i32
    %30 = arith.andi %28, %29 : i1
    %31 = arith.extui %30 : i1 to i32
    %c0_i32_18 = arith.constant 0 : i32
    %32 = arith.cmpi ne, %31, %c0_i32_18 : i32
    scf.if %32 {
      %c0_19 = arith.constant 0 : index
      %c0_20 = arith.constant 0 : index
      %33 = vector.load %arg18[%c0_19, %c0_20] : memref<1x128xf32, #tpu.memory_space<vmem>>, vector<1x128xf32>
      %cst_21 = arith.constant 6.250000e-02 : f32
      %34 = vector.broadcast %cst_21 : f32 to vector<1x128xf32>
      %35 = arith.mulf %33, %34 : vector<1x128xf32>
      %c0_22 = arith.constant 0 : index
      %c0_23 = arith.constant 0 : index
      %36 = vector.load %arg19[%c0_22, %c0_23] : memref<1x128xf32, #tpu.memory_space<vmem>>, vector<1x128xf32>
      %cst_24 = arith.constant 6.250000e-02 : f32
      %37 = vector.broadcast %cst_24 : f32 to vector<1x128xf32>
      %38 = arith.mulf %36, %37 : vector<1x128xf32>
      %39 = arith.mulf %35, %35 : vector<1x128xf32>
      %40 = arith.subf %38, %39 : vector<1x128xf32>
      %cst_25 = arith.constant 0.000000e+00 : f32
      %41 = vector.broadcast %cst_25 : f32 to vector<1x128xf32>
      %42 = arith.maximumf %40, %41 : vector<1x128xf32>
      %cst_26 = arith.constant 9.99999974E-6 : f32
      %43 = vector.broadcast %cst_26 : f32 to vector<1x128xf32>
      %44 = arith.addf %42, %43 : vector<1x128xf32>
      %45 = math.rsqrt %44 : vector<1x128xf32>
      %c0_27 = arith.constant 0 : index
      %c0_28 = arith.constant 0 : index
      %c0_29 = arith.constant 0 : index
      %46 = vector.load %arg9[%c0_27, %c0_28, %c0_29] : memref<1x1x128xf32, #tpu.memory_space<vmem>>, vector<1x1x128xf32>
      %47 = vector.shape_cast %46 : vector<1x1x128xf32> to vector<1x128xf32>
      %48 = arith.mulf %47, %45 : vector<1x128xf32>
      %c0_30 = arith.constant 0 : index
      %c0_31 = arith.constant 0 : index
      %c0_32 = arith.constant 0 : index
      %49 = vector.load %arg10[%c0_30, %c0_31, %c0_32] : memref<1x1x128xf32, #tpu.memory_space<vmem>>, vector<1x1x128xf32>
      %50 = vector.shape_cast %49 : vector<1x1x128xf32> to vector<1x128xf32>
      %51 = arith.mulf %35, %48 : vector<1x128xf32>
      %52 = arith.subf %50, %51 : vector<1x128xf32>
      %c0_33 = arith.constant 0 : index
      %c0_34 = arith.constant 0 : index
      %53 = vector.load %arg16[%c0_33, %c0_34] : memref<128x128xf32, #tpu.memory_space<vmem>>, vector<128x128xf32>
      %54 = vector.broadcast %48 : vector<1x128xf32> to vector<128x128xf32>
      %55 = arith.mulf %53, %54 : vector<128x128xf32>
      %56 = vector.broadcast %52 : vector<1x128xf32> to vector<128x128xf32>
      %57 = arith.addf %55, %56 : vector<128x128xf32>
      %c0_35 = arith.constant 0 : index
      %c0_36 = arith.constant 0 : index
      %58 = vector.load %arg15[%c0_35, %c0_36] : memref<128x128xf32, #tpu.memory_space<vmem>>, vector<128x128xf32>
      tpu.vector_store %arg15[%c0_35, %c0_36], %57 {strides = array<i32>} : memref<128x128xf32, #tpu.memory_space<vmem>>, vector<128x128xf32>,
      %c0_i32_37 = arith.constant 0 : i32
      %c0_i32_38 = arith.constant 0 : i32
      %c0_i32_39 = arith.constant 0 : i32
      %59 = tpu.memref_slice %arg13[%arg0, %c0_i32_38, %c0_i32_39] : memref<3x128x128xf32, #tpu.memory_space<any>> -> memref<1x128x128xf32, #tpu.memory_space<any>>
      %60 = tpu.memref_squeeze %59 : memref<1x128x128xf32, #tpu.memory_space<any>> -> memref<128x128xf32, #tpu.memory_space<any>>
      %61 = tpu.memref_slice %arg21[%c0_i32_37] : memref<2x!tpu.dma_semaphore, #tpu.memory_space<semaphore_mem>> -> memref<1x!tpu.dma_semaphore, #tpu.memory_space<semaphore_mem>>
      %62 = tpu.memref_squeeze %61 : memref<1x!tpu.dma_semaphore, #tpu.memory_space<semaphore_mem>> -> memref<!tpu.dma_semaphore, #tpu.memory_space<semaphore_mem>>
      tpu.enqueue_dma source(%arg15 : memref<128x128xf32, #tpu.memory_space<vmem>>) target(%60 : memref<128x128xf32, #tpu.memory_space<any>>) target_semaphore(%62 : memref<!tpu.dma_semaphore, #tpu.memory_space<semaphore_mem>>)
      %c0_i32_40 = arith.constant 0 : i32
      %c0_i32_41 = arith.constant 0 : i32
      %c0_i32_42 = arith.constant 0 : i32
      %63 = tpu.memref_slice %arg13[%arg0, %c0_i32_41, %c0_i32_42] : memref<3x128x128xf32, #tpu.memory_space<any>> -> memref<1x128x128xf32, #tpu.memory_space<any>>
      %64 = tpu.memref_squeeze %63 : memref<1x128x128xf32, #tpu.memory_space<any>> -> memref<128x128xf32, #tpu.memory_space<any>>
      %65 = tpu.memref_slice %arg21[%c0_i32_40] : memref<2x!tpu.dma_semaphore, #tpu.memory_space<semaphore_mem>> -> memref<1x!tpu.dma_semaphore, #tpu.memory_space<semaphore_mem>>
      %66 = tpu.memref_squeeze %65 : memref<1x!tpu.dma_semaphore, #tpu.memory_space<semaphore_mem>> -> memref<!tpu.dma_semaphore, #tpu.memory_space<semaphore_mem>>
      tpu.wait_dma2 semaphore(%66 : memref<!tpu.dma_semaphore, #tpu.memory_space<semaphore_mem>>) src(%arg15 : memref<128x128xf32, #tpu.memory_space<vmem>>) dst(%64 : memref<128x128xf32, #tpu.memory_space<any>>)
      %c0_43 = arith.constant 0 : index
      %c0_44 = arith.constant 0 : index
      %67 = vector.load %arg20[%c0_43, %c0_44] : memref<8x128xf32, #tpu.memory_space<vmem>>, vector<8x128xf32>
      %68 = vector.broadcast %48 : vector<1x128xf32> to vector<8x128xf32>
      %69 = arith.mulf %67, %68 : vector<8x128xf32>
      %c0_45 = arith.constant 0 : index
      %c0_46 = arith.constant 0 : index
      %70 = vector.load %arg12[%c0_45, %c0_46] : memref<8x1xf32, #tpu.memory_space<vmem>>, vector<8x1xf32>
      %71 = vector.broadcast %70 : vector<8x1xf32> to vector<8x128xf32>
      %72 = vector.broadcast %52 : vector<1x128xf32> to vector<8x128xf32>
      %73 = arith.mulf %71, %72 : vector<8x128xf32>
      %74 = arith.addf %69, %73 : vector<8x128xf32>
      %c0_47 = arith.constant 0 : index
      %c0_48 = arith.constant 0 : index
      %75 = vector.load %arg14[%c0_47, %c0_48] : memref<8x128xf32, #tpu.memory_space<vmem>>, vector<8x128xf32>
      tpu.vector_store %arg14[%c0_47, %c0_48], %74 {strides = array<i32>} : memref<8x128xf32, #tpu.memory_space<vmem>>, vector<8x128xf32>,
    } else {
    }
    return
  }
  func.func @transform_2(%arg0: i32, %arg1: i32, %arg2: i32) -> (i32, i32, i32) {
    %c0_i32 = arith.constant 0 : i32
    %c0_i32_0 = arith.constant 0 : i32
    %c0_i32_1 = arith.constant 0 : i32
    return %arg0, %c0_i32, %c0_i32_0 : i32, i32, i32
  }
  func.func @transform_3(%arg0: i32, %arg1: i32, %arg2: i32) -> (i32, i32, i32) {
    %c0_i32 = arith.constant 0 : i32
    %c0_i32_0 = arith.constant 0 : i32
    %c0_i32_1 = arith.constant 0 : i32
    return %arg0, %c0_i32, %c0_i32_0 : i32, i32, i32
  }
  func.func @transform_4(%arg0: i32, %arg1: i32, %arg2: i32) -> (i32, i32, i32) {
    %c0_i32 = arith.constant 0 : i32
    %c0_i32_0 = arith.constant 0 : i32
    %c0_i32_1 = arith.constant 0 : i32
    return %arg0, %c0_i32, %c0_i32_0 : i32, i32, i32
  }
  func.func @transform_5(%arg0: i32, %arg1: i32, %arg2: i32) -> (i32, i32, i32) {
    %c0_i32 = arith.constant 0 : i32
    %c0_i32_0 = arith.constant 0 : i32
    %c0_i32_1 = arith.constant 0 : i32
    return %arg0, %c0_i32, %c0_i32_0 : i32, i32, i32
  }
  func.func @transform_6(%arg0: i32, %arg1: i32, %arg2: i32) -> (i32, i32, i32) {
    %c0_i32 = arith.constant 0 : i32
    %c0_i32_0 = arith.constant 0 : i32
    %c0_i32_1 = arith.constant 0 : i32
    return %arg0, %c0_i32, %c0_i32_0 : i32, i32, i32
  }
  func.func @transform_7(%arg0: i32, %arg1: i32, %arg2: i32) -> (i32, i32, i32) {
    %c0_i32 = arith.constant 0 : i32
    %c0_i32_0 = arith.constant 0 : i32
    %c0_i32_1 = arith.constant 0 : i32
    return %arg0, %c0_i32, %c0_i32_0 : i32, i32, i32
  }
  func.func @transform_8(%arg0: i32, %arg1: i32, %arg2: i32) -> (i32, i32) {
    %c0_i32 = arith.constant 0 : i32
    %c0_i32_0 = arith.constant 0 : i32
    return %c0_i32, %arg1 : i32, i32
  }
  func.func @transform_9(%arg0: i32, %arg1: i32, %arg2: i32) -> (i32, i32) {
    %c0_i32 = arith.constant 0 : i32
    %c0_i32_0 = arith.constant 0 : i32
    %c0_i32_1 = arith.constant 0 : i32
    return %c0_i32, %c0_i32_0 : i32, i32
  }
  func.func @transform_11(%arg0: i32, %arg1: i32, %arg2: i32) -> (i32, i32) {
    %c0_i32 = arith.constant 0 : i32
    %c0_i32_0 = arith.constant 0 : i32
    return %c0_i32, %arg0 : i32, i32
  }
}

</mosaic_0001>

<bundles_post_ra>
// kernel: gconv_forward.1
= control target key start
LH: loop header
LB: loop body
LE: loop exit
PB: predicated region body
PF: predicated region fallthrough
CT: control target
= control target key end

     0   :  { %s2147_s17 = smov 0   ;;  %s2149_s18 = smov 0   ;;  %s2351_s0 = inlined_call_operand.vmem [shape: bf16[128,128], index: 0, kind: input, shape index: {}]   ;;  %s2352_s1 = inlined_call_operand.vmem [shape: f32[128,128], index: 1, kind: input, shape index: {}]   ;;  %s2353_s2 = inlined_call_operand.vmem [shape: bf16[3,128,128], index: 2, kind: input, shape index: {}]   ;;  %s2354_s3 = inlined_call_operand.vmem [shape: f32[3,1,128], index: 3, kind: input, shape index: {}]   ;;  %s2355_s4 = inlined_call_operand.vmem [shape: bf16[3,128,128], index: 4, kind: input, shape index: {}]   ;;  %s2356_s5 = inlined_call_operand.vmem [shape: f32[3,1,128], index: 5, kind: input, shape index: {}]   ;;  %s2357_s6 = inlined_call_operand.vmem [shape: f32[3,1,128], index: 6, kind: input, shape index: {}]   ;;  %s2358_s7 = inlined_call_operand.vmem [shape: f32[3,1,128], index: 7, kind: input, shape index: {}]   ;;  %s2359_s8 = inlined_call_operand.vmem [shape: bf16[8,128], index: 8, kind: input, shape index: {}]   ;;  %s2360_s9 = inlined_call_operand.vmem [shape: f32[8,1], index: 9, kind: input, shape index: {}]   ;;  %s2361_s10 = inlined_call_operand.vmem [shape: f32[3,128,128], index: 10, kind: output, shape index: {0}]   ;;  %s2362_s11 = inlined_call_operand.vmem [shape: f32[8,384], index: 11, kind: output, shape index: {1}]  }
   0x1   :  { %2365 = sst [smem:[#allocation19_spill]] %s2353_s2  ;;  %s2151_s19 = smov 0  }
   0x2 LB: > { %2366 = sst [smem:[#allocation16_spill]] %s2078_s18  ;;  %s41_s20 = sadd.s32 1, %s2078_s18  ;;  %s2082_s19 = sphi %s2151_s19, %s22_s19   ;;  %s2078_s18 = sphi %s2149_s18, %s2373_s18   ;;  %s2074_s17 = sphi %s2147_s17, %s2372_s17  }
   0x3   : > { %2367 = sst [smem:[#allocation17_spill]] %s2082_s19  ;;  %p1789_p0 = scmp.ge.s32.totalorder %s2082_s19, 1 }
   0x4   : > { %p43_p1 = scmp.ge.s32.totalorder %s41_s20, 3  ;;  %p336_p2 = scmp.lt.s32.totalorder %s2082_s19, 4 }
   0x6   : > { %s2375_s20 = smov (%p43_p1, %s41_s20), 0  ;;  %p337_p3 = pnand %p1789_p0, %p336_p2 }
   0x7   : > { %2368 = sst [smem:[#allocation18_spill]] %s2375_s20  ;;  %p390_p4 = scmp.lt.s32.totalorder (!%p337_p3), %s2074_s17, 2 }
   0x8   : > { %340 = sbr.rel (%p337_p3) target bundleno = 1021 (0x3fd), region = 52  ;;  %p421_p5 = scmp.eq.s32.totalorder (!%p337_p3), %s2074_s17, 0 }
   0x9   : > { %s2369_s2 = sld [smem:[#allocation19_spill]] (!%p337_p3) }
   0xd   : > { %s2170_s21 = scalar_select %p390_p4, %s2074_s17, 2  ;;  %v463_v0 = vld [vmem:[%s2352_s1] sm:$0xff] (%p421_p5)  ;;  %v465_v1 = vld [vmem:[%s2352_s1 + $0x8] sm:$0xff] (%p421_p5)  ;;  %v467_v2 = vld [vmem:[%s2352_s1 + $0x10] sm:$0xff] (%p421_p5) }
   0xe   : > { %464 = vst [vmem:[#allocation2 + $0x30] sm:$0xff] (%p421_p5), %v463_v0  ;;  %466 = vst [vmem:[#allocation2] sm:$0xff] (%p421_p5), %v465_v1  ;;  %v469_v3 = vld [vmem:[%s2352_s1 + $0x18] sm:$0xff] (%p421_p5)  ;;  %v471_v4 = vld [vmem:[%s2352_s1 + $0x20] sm:$0xff] (%p421_p5) }
   0xf   : > { %s1828_s22 = sshll.u32 %s2170_s21, 6  ;;  %s405_s15 = scalar_lea.vmem %s2356_s5, %s2170_s21  ;;  %468 = vst [vmem:[#allocation2 + $0x58] sm:$0xff] (%p421_p5), %v467_v2  ;;  %v473_v5 = vld [vmem:[%s2352_s1 + $0x28] sm:$0xff] (%p421_p5)  ;;  %470 = vst [vmem:[#allocation2 + $0x18] sm:$0xff] (%p421_p5), %v469_v3  ;;  %v475_v6 = vld [vmem:[%s2352_s1 + $0x30] sm:$0xff] (%p421_p5) }
  0x10   : > { %s2180_s28 = scalar_lea.vmem %s2369_s2, %s1828_s22  ;;  %s2185_s12 = scalar_lea.vmem %s2355_s4, %s1828_s22  ;;  %472 = vst [vmem:[#allocation2 + $0x50] sm:$0xff] (%p421_p5), %v471_v4  ;;  %474 = vst [vmem:[#allocation2 + $0x68] sm:$0xff] (%p421_p5), %v473_v5  ;;  %v477_v7 = vld [vmem:[%s2352_s1 + $0x38] sm:$0xff] (%p421_p5)  ;;  %v479_v8 = vld [vmem:[%s2352_s1 + $0x40] sm:$0xff] (%p421_p5) }
  0x11   : > { %s408_s18 = scalar_lea.vmem %s2357_s6, %s2170_s21  ;;  %s411_s25 = scalar_lea.vmem %s2358_s7, %s2170_s21  ;;  %476 = vst [vmem:[#allocation2 + $0x8] sm:$0xff] (%p421_p5), %v475_v6  ;;  %478 = vst [vmem:[#allocation2 + $0x48] sm:$0xff] (%p421_p5), %v477_v7  ;;  %v481_v9 = vld [vmem:[%s2352_s1 + $0x48] sm:$0xff] (%p421_p5)  ;;  %v483_v10 = vld [vmem:[%s2352_s1 + $0x50] sm:$0xff] (%p421_p5) }
  0x12   : > { %s1794_s26 = sshll.u32 %s2170_s21, 3  ;;  %429 = sbr.rel (!%p421_p5) target bundleno = 33 (0x21), region = 56  ;;  %480 = vst [vmem:[#allocation2 + $0x40] sm:$0xff] (%p421_p5), %v479_v8  ;;  %v485_v11 = vld [vmem:[%s2352_s1 + $0x58] sm:$0xff] (%p421_p5)  ;;  %482 = vst [vmem:[#allocation2 + $0x20] sm:$0xff] (%p421_p5), %v481_v9  ;;  %v487_v12 = vld [vmem:[%s2352_s1 + $0x60] sm:$0xff] (%p421_p5) }
  0x13   : > { %s2203_s19 = scalar_lea.vmem %s2362_s11, %s1794_s26  ;;  %484 = vst [vmem:[#allocation2 + $0x10] sm:$0xff] (%p421_p5), %v483_v10  ;;  %486 = vst [vmem:[#allocation2 + $0x38] sm:$0xff] (%p421_p5), %v485_v11  ;;  %v489_v13 = vld [vmem:[%s2352_s1 + $0x68] sm:$0xff] (%p421_p5)  ;;  %v491_v14 = vld [vmem:[%s2352_s1 + $0x70] sm:$0xff] (%p421_p5) }
  0x14   : > { %488 = vst [vmem:[#allocation2 + $0x60] sm:$0xff] (%p421_p5), %v487_v12  ;;  %490 = vst [vmem:[#allocation2 + $0x70] sm:$0xff] (%p421_p5), %v489_v13  ;;  %v493_v15 = vld [vmem:[%s2352_s1 + $0x78] sm:$0xff] (%p421_p5) }
  0x15   : > { %492 = vst [vmem:[#allocation2 + $0x78] sm:$0xff] (%p421_p5), %v491_v14  ;;  %494 = vst [vmem:[#allocation2 + $0x28] sm:$0xff] (%p421_p5), %v493_v15 }
  0x17   : > { %502 = vsyncadd [#allocation8], 2048  ;;  %v537_v16 = vld [vmem:[%s2351_s0] sm:$0xff]  ;;  %v539_v17 = vld [vmem:[%s2351_s0 + $0x8] sm:$0xff] }
  0x18   : > { %538 = vst [vmem:[#allocation9] sm:$0xff] %v537_v16  ;;  %540 = vst [vmem:[#allocation9 + $0x8] sm:$0xff] %v539_v17  ;;  %v541_v18 = vld [vmem:[%s2351_s0 + $0x10] sm:$0xff]  ;;  %v543_v19 = vld [vmem:[%s2351_s0 + $0x18] sm:$0xff] }
  0x19   : > { %v545_v20 = vld [vmem:[%s2351_s0 + $0x20] sm:$0xff]  ;;  %542 = vst [vmem:[#allocation9 + $0x10] sm:$0xff] %v541_v18  ;;  %544 = vst [vmem:[#allocation9 + $0x18] sm:$0xff] %v543_v19  ;;  %v547_v21 = vld [vmem:[%s2351_s0 + $0x28] sm:$0xff] }
  0x1a   : > { %546 = vst [vmem:[#allocation9 + $0x20] sm:$0xff] %v545_v20  ;;  %v549_v22 = vld [vmem:[%s2351_s0 + $0x30] sm:$0xff]  ;;  %v551_v23 = vld [vmem:[%s2351_s0 + $0x38] sm:$0xff]  ;;  %548 = vst [vmem:[#allocation9 + $0x28] sm:$0xff] %v547_v21 }
  0x1b   : > { %550 = vst [vmem:[#allocation9 + $0x30] sm:$0xff] %v549_v22  ;;  %552 = vst [vmem:[#allocation9 + $0x38] sm:$0xff] %v551_v23 }
  0x1c   : > { %560 = vsyncadd [#allocation8 + $0x1], 1024 }
  0x1d   : > { %2066 = dma.done.wait [#allocation8 + $0x1], 1024 }
  0x1e   : > { %2067 = vsyncadd [#allocation8 + $0x1], 4294966272 }
  0x1f   : > { %2068 = dma.done.wait [#allocation8], 2048 }
  0x20   : > { %2069 = vsyncadd [#allocation8], 4294965248 }
  0x21 PF: > { %v2027_v35 = vld [vmem:[#allocation9] sm:$0xff]   ;;  %v2031_v39 = vld [vmem:[%s2180_s28 + $0x38] sm:$0xff]   ;;  %v2032_v40 = vld [vmem:[%s2180_s28 + $0x30] sm:$0xff]   ;;  %s2370_s29 = scalar_lea.vmem %s2354_s3, %s2170_s21  ;;  %vm2085_vm0 = vmmov 0   ;;  %s1823_s23 = sshll.u32 %s2074_s17, 7 }
  0x22   : > { %v602_v36 = vld [vmem:[#allocation2 + $0x8] sm:$0xff]  ;;  %1898 = vmatprep.mubr.bf16.mxu0 %v2027_v35  ;;  %v600_v41 = vld [vmem:[#allocation2 + $0x50] sm:$0xff]  ;;  %1914 = vmatprep.subr.bf16.mxu1 %v2031_v39  ;;  %v598_v45 = vld [vmem:[#allocation2 + $0x58] sm:$0xff] }
  0x23   : > { %v604_v32 = vld [vmem:[#allocation2 + $0x40] sm:$0xff]  ;;  %v603_v38 = vld [vmem:[#allocation2 + $0x48] sm:$0xff]  ;;  %1915 = vmatpush3.bf16.msra.mxu1 %v2031_v39  ;;  %v599_v47 = vld [vmem:[#allocation2 + $0x18] sm:$0xff] }
  0x24   : > { %v606_v30 = vld [vmem:[#allocation2 + $0x10] sm:$0xff]  ;;  %v607_v31 = vld [vmem:[#allocation2 + $0x38] sm:$0xff]  ;;  %v605_v34 = vld [vmem:[#allocation2 + $0x20] sm:$0xff]  ;;  %v615_v42 = vpack.c.bf16 %v603_v38, %v602_v36  ;;  %1916 = vmatprep.subr.bf16.mxu1 %v2032_v40  ;;  %v613_v52 = vpack.c.bf16 %v599_v47, %v598_v45 }
  0x25   : > { %v608_v26 = vld [vmem:[#allocation2 + $0x60] sm:$0xff]  ;;  %v609_v28 = vld [vmem:[#allocation2 + $0x70] sm:$0xff]  ;;  %v617_v33 = vpack.c.bf16 %v607_v31, %v606_v30  ;;  %v616_v37 = vpack.c.bf16 %v605_v34, %v604_v32  ;;  %v601_v43 = vld [vmem:[#allocation2 + $0x68] sm:$0xff] }
  0x26   : > { %v610_v24 = vld [vmem:[#allocation2 + $0x78] sm:$0xff]  ;;  %v611_v25 = vld [vmem:[#allocation2 + $0x28] sm:$0xff]  ;;  %v618_v29 = vpack.c.bf16 %v609_v28, %v608_v26  ;;  %v614_v46 = vpack.c.bf16 %v601_v43, %v600_v41  ;;  %v2036_v48 = vld [vmem:[%s2180_s28 + $0x20] sm:$0xff]  }
  0x27   : > { %v619_v27 = vpack.c.bf16 %v611_v25, %v610_v24  ;;  %v2035_v44 = vld [vmem:[%s2180_s28 + $0x28] sm:$0xff]   ;;  %1917 = vmatpush3.bf16.msra.mxu1 %v2032_v40  ;;  %v596_v49 = vld [vmem:[#allocation2 + $0x30] sm:$0xff]  ;;  %v597_v50 = vld [vmem:[#allocation2] sm:$0xff] }
  0x28   : > { %1918 = vmatprep.subr.bf16.mxu1 %v2035_v44  ;;  %v2039_v51 = vld [vmem:[%s2180_s28 + $0x18] sm:$0xff]   ;;  %v612_v53 = vpack.c.bf16 %v597_v50, %v596_v49  ;;  %v2040_v54 = vld [vmem:[%s2180_s28 + $0x10] sm:$0xff]   ;;  %v2033_v58 = vld [vmem:[#allocation9 + $0x20] sm:$0xff]  }
  0x29   : > { %1882 = vmatprep.subr.bf16.mxu0 %v619_v27  ;;  %v2028_v55 = vld [vmem:[#allocation9 + $0x8] sm:$0xff]   ;;  %v2029_v56 = vld [vmem:[#allocation9 + $0x10] sm:$0xff]   ;;  %v2030_v57 = vld [vmem:[#allocation9 + $0x18] sm:$0xff]  }
  0x2a   : > { %1883 = vmatpush3.bf16.msra.mxu0 %v619_v27  ;;  %v2034_v59 = vld [vmem:[#allocation9 + $0x28] sm:$0xff]   ;;  %v2037_v60 = vld [vmem:[#allocation9 + $0x30] sm:$0xff]   ;;  %v2038_v61 = vld [vmem:[#allocation9 + $0x38] sm:$0xff]  }
  0x2b   : > { %1884 = vmatprep.subr.bf16.mxu0 %v618_v29  ;;  %1919 = vmatpush3.bf16.msra.mxu1 %v2035_v44  ;;  %v2041_v62 = vld [vmem:[%s2180_s28 + $0x8] sm:$0xff]   ;;  %v2042_v63 = vld [vmem:[%s2180_s28] sm:$0xff]   ;;  %v2043_v0 = vld [vmem:[%s2185_s12 + $0x38] sm:$0xff]  }
  0x2c   : > { %1920 = vmatprep.subr.bf16.mxu1 %v2036_v48  ;;  %v2044_v1 = vld [vmem:[%s2185_s12 + $0x30] sm:$0xff]   ;;  %v2045_v2 = vld [vmem:[%s2185_s12 + $0x28] sm:$0xff]   ;;  %v2046_v3 = vld [vmem:[%s2185_s12 + $0x20] sm:$0xff]  }
  0x2d   : > { %v2047_v4 = vld [vmem:[%s2185_s12 + $0x18] sm:$0xff]   ;;  %v2049_v30 = vld [vmem:[%s2185_s12 + $0x8] sm:$0xff]   ;;  %v2050_v31 = vld [vmem:[%s2185_s12] sm:$0xff]  }
  0x2e   : > { %1885 = vmatpush3.bf16.msra.mxu0 %v618_v29  ;;  %v2048_v29 = vld [vmem:[%s2185_s12 + $0x10] sm:$0xff]   ;;  %v1805_v34 = vld [vmem:[%s2370_s29] ss:$0 sm:$0xff] }
  0x2f   : > { %1886 = vmatprep.subr.bf16.mxu0 %v617_v33  ;;  %1921 = vmatpush3.bf16.msra.mxu1 %v2036_v48 }
  0x30   : > { %1922 = vmatprep.subr.bf16.mxu1 %v2039_v51 }
  0x32   : > { %1887 = vmatpush3.bf16.msra.mxu0 %v617_v33 }
  0x33   : > { %1888 = vmatprep.subr.bf16.mxu0 %v616_v37  ;;  %1923 = vmatpush3.bf16.msra.mxu1 %v2039_v51 }
  0x34   : > { %1924 = vmatprep.subr.bf16.mxu1 %v2040_v54 }
  0x36   : > { %1889 = vmatpush3.bf16.msra.mxu0 %v616_v37 }
  0x37   : > { %1890 = vmatprep.subr.bf16.mxu0 %v615_v42  ;;  %1925 = vmatpush3.bf16.msra.mxu1 %v2040_v54 }
  0x38   : > { %1926 = vmatprep.subr.bf16.mxu1 %v2041_v62 }
  0x3a   : > { %1891 = vmatpush3.bf16.msra.mxu0 %v615_v42 }
  0x3b   : > { %1892 = vmatprep.subr.bf16.mxu0 %v614_v46  ;;  %1927 = vmatpush3.bf16.msra.mxu1 %v2041_v62 }
  0x3c   : > { %1928 = vmatprep.subr.bf16.mxu1 %v2042_v63 }
  0x3e   : > { %1893 = vmatpush3.bf16.msra.mxu0 %v614_v46 }
  0x3f   : > { %1894 = vmatprep.subr.bf16.mxu0 %v613_v52  ;;  %1929 = vmatpush3.bf16.msra.mxu1 %v2042_v63 }
  0x40   : > { %1984 = vmatprep.subr.bf16.mxu1 %v2043_v0 }
  0x42   : > { %1895 = vmatpush3.bf16.msra.mxu0 %v613_v52 }
  0x43   : > { %1896 = vmatprep.subr.bf16.mxu0 %v612_v53 }
  0x46   : > { %1897 = vmatpush3.bf16.msra.mxu0 %v612_v53 }
  0x47   : > { %1946 = vmatprep.subr.bf16.mxu0 %v2043_v0 }
  0x49   : > { %1899 = vmatmul.mubr.bf16.vlgmr.msra.gmra.mxu0 %v2028_v55 }
  0x4a   : > { %1902 = vmatprep.mubr.bf16.mxu0 %v2029_v56  ;;  %1947 = vmatpush3.bf16.msra.mxu0 %v2043_v0 }
  0x4b   : > { %1948 = vmatprep.subr.bf16.mxu0 %v2044_v1 }
  0x4e   : > { %1949 = vmatpush3.bf16.msra.mxu0 %v2044_v1 }
  0x4f   : > { %1950 = vmatprep.subr.bf16.mxu0 %v2045_v2 }
  0x51   : > { %1903 = vmatmul.mubr.bf16.gmra.mxu0 %v2030_v57 }
  0x52   : > { %1906 = vmatprep.mubr.bf16.mxu0 %v2033_v58  ;;  %1951 = vmatpush3.bf16.msra.mxu0 %v2045_v2 }
  0x53   : > { %1952 = vmatprep.subr.bf16.mxu0 %v2046_v3 }
  0x56   : > { %1953 = vmatpush3.bf16.msra.mxu0 %v2046_v3 }
  0x57   : > { %1954 = vmatprep.subr.bf16.mxu0 %v2047_v4 }
  0x59   : > { %1907 = vmatmul.mubr.bf16.gmra.mxu0 %v2034_v59 }
  0x5a   : > { %1910 = vmatprep.mubr.bf16.mxu0 %v2037_v60  ;;  %1955 = vmatpush3.bf16.msra.mxu0 %v2047_v4 }
  0x5b   : > { %1956 = vmatprep.subr.bf16.mxu0 %v2048_v29 }
  0x5e   : > { %1957 = vmatpush3.bf16.msra.mxu0 %v2048_v29 }
  0x5f   : > { %1958 = vmatprep.subr.bf16.mxu0 %v2049_v30 }
  0x61   : > { %1911 = vmatmul.mubr.bf16.gmra.mxu0 %v2038_v61 }
  0x62   : > { %1959 = vmatpush3.bf16.msra.mxu0 %v2049_v30 }
  0x63   : > { %1960 = vmatprep.subr.bf16.mxu0 %v2050_v31 }
  0x66   : > { %1961 = vmatpush3.bf16.msra.mxu0 %v2050_v31 }
 0x109   : > { %v1900_v5 = vpop.f32.mrf.mxu0 }
 0x10b   : > { %v734_v6 = vpop.f32.mrf.mxu0 }
 0x10d   : > { %v1901_v7 = vpop.f32.mrf.mxu0 }
 0x10e   : > { %v849_v10 = vpack.c.bf16 %v1901_v7, %v1900_v5 }
 0x10f   : > { %v737_v8 = vpop.f32.mrf.mxu0 }
 0x110   : > { %v848_v9 = vpack.c.bf16 %v737_v8, %v734_v6 }
 0x111   : > { %v1904_v11 = vpop.f32.mrf.mxu0 }
 0x112   : > { %1930 = vmatprep.mubr.bf16.mxu1 %v848_v9 }
 0x113   : > { %1931 = vmatmul.mubr.bf16.vlgmr.msra.gmra.mxu1 %v849_v10  ;;  %v750_v12 = vpop.f32.mrf.mxu0 }
 0x114   : > { %1992 = vmatpush3.bf16.msra.mxu1 %v2043_v0 }
 0x115   : > { %v1905_v13 = vpop.f32.mrf.mxu0  ;;  %1985 = vmatprep.subr.bf16.mxu1 %v2044_v1 }
 0x116   : > { %v851_v14 = vpack.c.bf16 %v1905_v13, %v1904_v11 }
 0x117   : > { %v753_v15 = vpop.f32.mrf.mxu0 }
 0x118   : > { %v850_v16 = vpack.c.bf16 %v753_v15, %v750_v12  ;;  %1993 = vmatpush3.bf16.msra.mxu1 %v2044_v1 }
 0x119   : > { %v1908_v17 = vpop.f32.mrf.mxu0  ;;  %1986 = vmatprep.subr.bf16.mxu1 %v2045_v2 }
 0x11a   : > { %1934 = vmatprep.mubr.bf16.mxu1 %v850_v16 }
 0x11b   : > { %v766_v18 = vpop.f32.mrf.mxu0  ;;  %1935 = vmatmul.mubr.bf16.gmra.mxu1 %v851_v14 }
 0x11c   : > { %1994 = vmatpush3.bf16.msra.mxu1 %v2045_v2 }
 0x11d   : > { %v1909_v19 = vpop.f32.mrf.mxu0  ;;  %1987 = vmatprep.subr.bf16.mxu1 %v2046_v3 }
 0x11e   : > { %v853_v20 = vpack.c.bf16 %v1909_v19, %v1908_v17 }
 0x11f   : > { %v769_v21 = vpop.f32.mrf.mxu0 }
 0x120   : > { %v852_v22 = vpack.c.bf16 %v769_v21, %v766_v18  ;;  %1995 = vmatpush3.bf16.msra.mxu1 %v2046_v3 }
 0x121   : > { %v1912_v23 = vpop.f32.mrf.mxu0  ;;  %1988 = vmatprep.subr.bf16.mxu1 %v2047_v4 }
 0x122   : > { %1938 = vmatprep.mubr.bf16.mxu1 %v852_v22 }
 0x123   : > { %v782_v24 = vpop.f32.mrf.mxu0  ;;  %1939 = vmatmul.mubr.bf16.gmra.mxu1 %v853_v20 }
 0x124   : > { %1996 = vmatpush3.bf16.msra.mxu1 %v2047_v4 }
 0x125   : > { %v1913_v25 = vpop.f32.mrf.mxu0  ;;  %1989 = vmatprep.subr.bf16.mxu1 %v2048_v29 }
 0x126   : > { %v855_v26 = vpack.c.bf16 %v1913_v25, %v1912_v23  ;;  %v2084_v25 = vmov 0.0  }
 0x127   : > { %v785_v27 = vpop.f32.mrf.mxu0  ;;  %591 = vst [vmem:[#allocation5] sm:$0x1] %v2084_v25  ;;  %592 = vst [vmem:[#allocation6] sm:$0x1] %v2084_v25 }
 0x128   : > { %v854_v28 = vpack.c.bf16 %v785_v27, %v782_v24  ;;  %1997 = vmatpush3.bf16.msra.mxu1 %v2048_v29  ;;  %v1814_v27 = vld [vmem:[%s405_s15] ss:$0 sm:$0xff] }
 0x129   : > { %1990 = vmatprep.subr.bf16.mxu1 %v2049_v30 }
 0x12a   : > { %1942 = vmatprep.mubr.bf16.mxu1 %v854_v28 }
 0x12b   : > { %1943 = vmatmul.mubr.bf16.gmra.mxu1 %v855_v26 }
 0x12c   : > { %1998 = vmatpush3.bf16.msra.mxu1 %v2049_v30 }
 0x12d   : > { %1991 = vmatprep.subr.bf16.mxu1 %v2050_v31 }
 0x130   : > { %1999 = vmatpush3.bf16.msra.mxu1 %v2050_v31 }
 0x131   : > { %1978 = vmatprep.subr.bf16.mxu1 %v2084_v25 }
 0x1d3   : > { %v1932_v32 = vpop.f32.mrf.mxu1 }
 0x1d4   : > { %v970_v38 = vadd.f32 %v1932_v32, %v1805_v34 }
 0x1d5   : > { %v961_v33 = vpop.f32.mrf.mxu1 }
 0x1d6   : > { %v962_v36 = vadd.f32 %v1805_v34, %v961_v33  ;;  %v1026_v45 = vmax.f32 %v970_v38, 0.0 }
 0x1d7   : > { %v1933_v35 = vpop.f32.mrf.mxu1 }
 0x1d8   : > { %v973_v37 = vadd.f32 %v1933_v35, %v1805_v34  ;;  %v1024_v43 = vmax.f32 %v962_v36, 0.0 }
 0x1d9   : > { %v964_v39 = vpop.f32.mrf.mxu1 }
 0x1da   : > { %v965_v40 = vadd.f32 %v1805_v34, %v964_v39  ;;  %v1027_v41 = vmax.f32 %v973_v37, 0.0 }
 0x1db   : > { %v1936_v42 = vpop.f32.mrf.mxu1 }
 0x1dc   : > { %v1025_v44 = vmax.f32 %v965_v40, 0.0  ;;  %v986_v46 = vadd.f32 %v1936_v42, %v1805_v34  ;;  %v1041_v50 = vpack.c.bf16 %v1027_v41, %v1026_v45 }
 0x1dd   : > { %v977_v47 = vpop.f32.mrf.mxu1 }
 0x1de   : > { %v1040_v48 = vpack.c.bf16 %v1025_v44, %v1024_v43  ;;  %v978_v49 = vadd.f32 %v1805_v34, %v977_v47  ;;  %v1030_v53 = vmax.f32 %v986_v46, 0.0  ;;  %v1381_v44 = vld [vmem:[%s2359_s8] sm:$0xf] }
 0x1df   : > { %v1937_v51 = vpop.f32.mrf.mxu1 }
 0x1e0   : > { %1962 = vmatprep.mubr.bf16.mxu0 %v1040_v48  ;;  %v989_v52 = vadd.f32 %v1937_v51, %v1805_v34  ;;  %v1028_v55 = vmax.f32 %v978_v49, 0.0 }
 0x1e1   : > { %1963 = vmatmul.mubr.bf16.vlgmr.msra.gmra.mxu0 %v1041_v50  ;;  %v980_v54 = vpop.f32.mrf.mxu1 }
 0x1e2   : > { %v1031_v56 = vmax.f32 %v989_v52, 0.0  ;;  %v981_v57 = vadd.f32 %v1805_v34, %v980_v54 }
 0x1e3   : > { %v1940_v58 = vpop.f32.mrf.mxu1 }
 0x1e4   : > { %v1029_v59 = vmax.f32 %v981_v57, 0.0  ;;  %v1043_v60 = vpack.c.bf16 %v1031_v56, %v1030_v53  ;;  %v1002_v61 = vadd.f32 %v1940_v58, %v1805_v34  ;;  %v1316_v57 = vld [vmem:[#allocation5] sm:$0x1] }
 0x1e5   : > { %v993_v62 = vpop.f32.mrf.mxu1 }
 0x1e6   : > { %v1042_v63 = vpack.c.bf16 %v1029_v59, %v1028_v55  ;;  %v994_v0 = vadd.f32 %v1805_v34, %v993_v62  ;;  %v1034_v3 = vmax.f32 %v1002_v61, 0.0  ;;  %v1340_v61 = vld [vmem:[#allocation6] sm:$0x1] }
 0x1e7   : > { %v1941_v1 = vpop.f32.mrf.mxu1 }
 0x1e8   : > { %v1005_v2 = vadd.f32 %v1941_v1, %v1805_v34  ;;  %1966 = vmatprep.mubr.bf16.mxu0 %v1042_v63  ;;  %v1032_v5 = vmax.f32 %v994_v0, 0.0 }
 0x1e9   : > { %v996_v4 = vpop.f32.mrf.mxu1  ;;  %1967 = vmatmul.mubr.bf16.gmra.mxu0 %v1043_v60 }
 0x1ea   : > { %v1035_v6 = vmax.f32 %v1005_v2, 0.0  ;;  %v997_v7 = vadd.f32 %v1805_v34, %v996_v4 }
 0x1eb   : > { %v1944_v8 = vpop.f32.mrf.mxu1 }
 0x1ec   : > { %v1033_v9 = vmax.f32 %v997_v7, 0.0  ;;  %v1045_v10 = vpack.c.bf16 %v1035_v6, %v1034_v3  ;;  %v1018_v11 = vadd.f32 %v1944_v8, %v1805_v34 }
 0x1ed   : > { %v1009_v12 = vpop.f32.mrf.mxu1 }
 0x1ee   : > { %v1044_v13 = vpack.c.bf16 %v1033_v9, %v1032_v5  ;;  %v1010_v14 = vadd.f32 %v1805_v34, %v1009_v12  ;;  %v1038_v17 = vmax.f32 %v1018_v11, 0.0 }
 0x1ef   : > { %v1945_v15 = vpop.f32.mrf.mxu1 }
 0x1f0   : > { %v1021_v16 = vadd.f32 %v1945_v15, %v1805_v34  ;;  %1970 = vmatprep.mubr.bf16.mxu0 %v1044_v13  ;;  %v1036_v19 = vmax.f32 %v1010_v14, 0.0  ;;  %v1465_v13 = vlaneseq  ;;  %v1443_v15 = vld [vmem:[%s408_s18] sm:$0x1]  ;;  %s2320_s18 = scalar_lea.vmem %s2361_s10, %s1823_s23 }
 0x1f1   : > { %v1012_v18 = vpop.f32.mrf.mxu1  ;;  %1971 = vmatmul.mubr.bf16.gmra.mxu0 %v1045_v10 }
 0x1f2   : > { %v1039_v20 = vmax.f32 %v1021_v16, 0.0  ;;  %v1013_v21 = vadd.f32 %v1805_v34, %v1012_v18  ;;  %v1466_v14 = vshrl.u32 %v1465_v13, 7 }
 0x1f4   : > { %v1037_v22 = vmax.f32 %v1013_v21, 0.0  ;;  %v1047_v23 = vpack.c.bf16 %v1039_v20, %v1038_v17  ;;  %v1467_v16 = vsub.s32 0, %v1466_v14 }
 0x1f6   : > { %v1046_v24 = vpack.c.bf16 %v1037_v22, %v1036_v19  ;;  %v1445_v19 = vld [vmem:[%s411_s25] sm:$0x1] }
 0x1f8   : > { %1974 = vmatprep.mubr.bf16.mxu1 %v1046_v24 }
 0x1f9   : > { %1975 = vmatmul.mubr.bf16.vlgmr.msra.gmra.mxu1 %v1047_v23 }
 0x1fa   : > { %1980 = vmatprep.mubr.msk.bf16.mxu1 %vm2085_vm0, %v2084_v25 }
 0x2a1   : > { %v1964_v26 = vpop.f32.mrf.mxu0 }
 0x2a3   : > { %v1153_v28 = vpop.f32.mrf.mxu0 }
 0x2a4   : > { %v1154_v29 = vadd.f32 %v1814_v27, %v1153_v28 }
 0x2a5   : > { %v1965_v30 = vpop.f32.mrf.mxu0 }
 0x2a6   : > { %v1216_v32 = vmax.f32 %v1154_v29, 0.0 }
 0x2a7   : > { %v1156_v31 = vpop.f32.mrf.mxu0 }
 0x2a8   : > { %v1157_v33 = vadd.f32 %v1814_v27, %v1156_v31  ;;  %v1341_v37 = vmul.f32 %v1216_v32, %v1216_v32 }
 0x2a9   : > { %v1968_v34 = vpop.f32.mrf.mxu0 }
 0x2aa   : > { %v1217_v35 = vmax.f32 %v1157_v33, 0.0 }
 0x2ab   : > { %v1169_v36 = vpop.f32.mrf.mxu0 }
 0x2ac   : > { %v1317_v38 = vadd.f32 %v1217_v35, %v1216_v32  ;;  %v1342_v39 = vmul.f32 %v1217_v35, %v1217_v35  ;;  %v1382_v40 = vpack.c.bf16 %v1217_v35, %v1216_v32 }
 0x2ad   : > { %v1969_v41 = vpop.f32.mrf.mxu0 }
 0x2ae   : > { %v1332_v42 = vrot.slane %v1317_v38, 4  ;;  %v1357_v43 = vadd.f32 %v1342_v39, %v1341_v37  ;;  %1979 = vmatpush3.bf16.msra.mxu1 %v1382_v40 }
 0x2af   : > { %v1172_v45 = vpop.f32.mrf.mxu0 }
 0x2b0   : > { %v1333_v46 = vadd.f32 %v1332_v42, %v1317_v38  ;;  %v1372_v47 = vrot.slane %v1357_v43, 4 }
 0x2b1   : > { %1981 = vmatmul.mubr.bf16.vlgmr.msra.gmra.mxu1 %v1381_v44  ;;  %v1972_v48 = vpop.f32.mrf.mxu0 }
 0x2b2   : > { %v1334_v49 = vrot.slane %v1333_v46, 2  ;;  %v1373_v50 = vadd.f32 %v1372_v47, %v1357_v43 }
 0x2b3   : > { %v1185_v51 = vpop.f32.mrf.mxu0 }
 0x2b4   : > { %v1335_v52 = vadd.f32 %v1334_v49, %v1333_v46  ;;  %v1374_v53 = vrot.slane %v1373_v50, 2 }
 0x2b5   : > { %v1973_v54 = vpop.f32.mrf.mxu0 }
 0x2b6   : > { %v1336_v55 = vrot.slane %v1335_v52, 1  ;;  %v1375_v56 = vadd.f32 %v1374_v53, %v1373_v50 }
 0x2b7   : > { %v1188_v58 = vpop.f32.mrf.mxu0 }
 0x2b8   : > { %v1337_v59 = vadd.f32 %v1336_v55, %v1335_v52  ;;  %v1376_v60 = vrot.slane %v1375_v56, 1 }
 0x2b9   : > { %v1976_v62 = vpop.f32.mrf.mxu1 }
 0x2ba   : > { %v1338_v63 = vadd.f32 %v1337_v59, %v1316_v57  ;;  %v1377_v0 = vadd.f32 %v1376_v60, %v1375_v56 }
 0x2bb   : > { %v1201_v1 = vpop.f32.mrf.mxu1 }
 0x2bc   : > { %1339 = vst [vmem:[#allocation5] sm:$0x1] %v1338_v63  ;;  %v1378_v2 = vadd.f32 %v1377_v0, %v1340_v61 }
 0x2bd   : > { %v1977_v3 = vpop.f32.mrf.mxu1 }
 0x2be   : > { %1379 = vst [vmem:[#allocation6] sm:$0x1] %v1378_v2 }
 0x2bf   : > { %v1204_v4 = vpop.f32.mrf.mxu1 }
 0x2c3   : > { %v1434_v5 = vld [vmem:[#allocation5] sm:$0x1] }
 0x2c4   : > { %v1435_v6 = vmul.f32 0.0625, %v1434_v5 }
 0x2c5   : > { %v1436_v7 = vld [vmem:[#allocation6] sm:$0x1] }
 0x2c6   : > { %v1437_v8 = vmul.f32 0.0625, %v1436_v7  ;;  %v1438_v9 = vmul.f32 %v1435_v6, %v1435_v6 }
 0x2c8   : > { %v1439_v10 = vsub.f32 %v1437_v8, %v1438_v9 }
 0x2ca   : > { %v1440_v11 = vmax.f32 %v1439_v10, 0.0 }
 0x2cc   : > { %v1441_v12 = vadd.f32 1e-05, %v1440_v11 }
 0x2ce   : > { %2051 = vrsqrt.f32 %v1441_v12 }
 0x2db   : > { %v2052_v17 = vpop.eup %2051 }
 0x2dc   : > { %v1444_v18 = vmul.f32 %v2052_v17, %v1443_v15 }
 0x2de   : > { %v1446_v20 = vmul.f32 %v1444_v18, %v1435_v6  ;;  %v1468_v21 = vrot.slane %v1444_v18, %v1467_v16 }
 0x2e0   : > { %v1447_v22 = vsub.f32 %v1445_v19, %v1446_v20  ;;  %v1470_v23 = vmul.f32 %v1468_v21, %v1216_v32  ;;  %v1471_v24 = vmul.f32 %v1468_v21, %v1217_v35  ;;  %v1472_v25 = vmul.f32 0.0, %v1468_v21 }
 0x2e2   : > { %v1490_v26 = vrot.slane %v1447_v22, %v1467_v16 }
 0x2e4   : > { %v1492_v27 = vadd.f32 %v1490_v26, %v1470_v23  ;;  %v1493_v28 = vadd.f32 %v1490_v26, %v1471_v24  ;;  %v1494_v29 = vadd.f32 %v1490_v26, %v1472_v25 }
 0x2e6   : > { %1508 = vst [vmem:[#allocation2 + $0x30] sm:$0xff] %v1492_v27  ;;  %1509 = vst [vmem:[#allocation2] sm:$0xff] %v1493_v28 }
 0x2e7   : > { %1510 = vst [vmem:[#allocation2 + $0x58] sm:$0xff] %v1494_v29  ;;  %1511 = vst [vmem:[#allocation2 + $0x18] sm:$0xff] %v1494_v29 }
 0x2e8   : > { %1512 = vst [vmem:[#allocation2 + $0x50] sm:$0xff] %v1494_v29  ;;  %1513 = vst [vmem:[#allocation2 + $0x68] sm:$0xff] %v1494_v29 }
 0x2e9   : > { %1514 = vst [vmem:[#allocation2 + $0x8] sm:$0xff] %v1494_v29  ;;  %1515 = vst [vmem:[#allocation2 + $0x48] sm:$0xff] %v1494_v29 }
 0x2ea   : > { %1516 = vst [vmem:[#allocation2 + $0x40] sm:$0xff] %v1494_v29  ;;  %1517 = vst [vmem:[#allocation2 + $0x20] sm:$0xff] %v1494_v29 }
 0x2eb   : > { %1518 = vst [vmem:[#allocation2 + $0x10] sm:$0xff] %v1494_v29  ;;  %1519 = vst [vmem:[#allocation2 + $0x38] sm:$0xff] %v1494_v29 }
 0x2ec   : > { %1520 = vst [vmem:[#allocation2 + $0x60] sm:$0xff] %v1494_v29  ;;  %1521 = vst [vmem:[#allocation2 + $0x70] sm:$0xff] %v1494_v29 }
 0x2ed   : > { %1522 = vst [vmem:[#allocation2 + $0x78] sm:$0xff] %v1494_v29  ;;  %1523 = vst [vmem:[#allocation2 + $0x28] sm:$0xff] %v1494_v29 }
 0x2ee   : > { %1560 = vst [vmem:[%s2320_s18] sm:$0xff] %v1492_v27  ;;  %1562 = vst [vmem:[%s2320_s18 + $0x8] sm:$0xff] %v1493_v28 }
 0x2ef   : > { %1564 = vst [vmem:[%s2320_s18 + $0x10] sm:$0xff] %v1494_v29  ;;  %1566 = vst [vmem:[%s2320_s18 + $0x18] sm:$0xff] %v1494_v29 }
 0x2f0   : > { %1568 = vst [vmem:[%s2320_s18 + $0x20] sm:$0xff] %v1494_v29  ;;  %1570 = vst [vmem:[%s2320_s18 + $0x28] sm:$0xff] %v1494_v29 }
 0x2f1   : > { %1572 = vst [vmem:[%s2320_s18 + $0x30] sm:$0xff] %v1494_v29  ;;  %1574 = vst [vmem:[%s2320_s18 + $0x38] sm:$0xff] %v1494_v29 }
 0x2f2   : > { %1576 = vst [vmem:[%s2320_s18 + $0x40] sm:$0xff] %v1494_v29  ;;  %1578 = vst [vmem:[%s2320_s18 + $0x48] sm:$0xff] %v1494_v29 }
 0x2f3   : > { %1580 = vst [vmem:[%s2320_s18 + $0x50] sm:$0xff] %v1494_v29  ;;  %1582 = vst [vmem:[%s2320_s18 + $0x58] sm:$0xff] %v1494_v29 }
 0x2f4   : > { %1584 = vst [vmem:[%s2320_s18 + $0x60] sm:$0xff] %v1494_v29  ;;  %1586 = vst [vmem:[%s2320_s18 + $0x68] sm:$0xff] %v1494_v29 }
 0x2f5   : > { %1588 = vst [vmem:[%s2320_s18 + $0x70] sm:$0xff] %v1494_v29  ;;  %1590 = vst [vmem:[%s2320_s18 + $0x78] sm:$0xff] %v1494_v29 }
 0x371   : > { %v1424_v30 = vpop.f32.mrf.mxu1 }
 0x373   : > { %v1982_v31 = vpop.f32.mrf.mxu1 }
 0x375   : > { %v1427_v32 = vpop.f32.mrf.mxu1 }
 0x377   : > { %v1983_v33 = vpop.f32.mrf.mxu1 }
 0x378   : > { %1598 = vsyncadd [#allocation8], 2048 }
 0x379   : > { %2070 = dma.done.wait [#allocation8], 2048 }
 0x37a   : > { %2071 = vsyncadd [#allocation8], 4294965248  ;;  %v2086_v34 = vmov 0   ;;  %v1604_v35 = vld [vmem:[%s2360_s9] sm:$0xff]  ;;  %v1603_v36 = vmul.f32 %v1468_v21, %v1424_v30 }
 0x37b   : > { %2053 = vset.pattern.permute.xlu0 %v2086_v34 }
 0x37c   : > { %1607 = vperm.xlu0 %2053, %v1604_v35  }
 0x3f7   : > { %v1608_v37 = vpop.permute.xlu0 %1607 }
 0x3f8   : > { %v1610_v38 = vmul.f32 %v1608_v37, %v1490_v26 }
 0x3fa   : > { %v1611_v39 = vadd.f32 %v1610_v38, %v1603_v36 }
 0x3fc   : > { %1612 = vst [vmem:[%s2203_s19] sm:$0xff] %v1611_v39 }
 0x3fd PF: > { %s2371_s25 = sld [smem:[#allocation17_spill]] }
 0x3fe   : > { %s2372_s17 = sld [smem:[#allocation16_spill]] }
 0x3ff   : > { %s2373_s18 = sld [smem:[#allocation18_spill]] }
 0x403   : > { %s22_s19 = sadd.s32 1, %s2371_s25  }
 0x404   : > { %p19_p6 = scmp.ge.s32.totalorder %s22_s19, 5  }
 0x406   :  { %21 = sbr.rel (!%p19_p6) target bundleno = 2 (0x2), region = 251 }
 0x40b   :  { %1632 = vsyncmov [#allocation8] }
 0x40e   :  { %s1633_s27 = vpop.sfrf %1632 }
 0x40f   :  { %p1826_p7 = scmp.ne.s32.totalorder %s1633_s27, 0 }
 0x411   :  { %1637 = shalt.err (%p1826_p7)  }
 0x412   :  { %1639 = vsyncmov [#allocation8 + $0x1] }
 0x415   :  { %s1640_s28 = vpop.sfrf %1639 }
 0x416   :  { %p1827_p8 = scmp.ne.s32.totalorder %s1640_s28, 0 }
 0x418   :  { %1644 = shalt.err (%p1827_p8)  }

</bundles_post_ra>
